<compile_context>
chip_gen: v7x
topology: tpu7x:2x2x1
jax: 0.10.0
libtpu: 0.0.40
codegen_flags: <defaults>
</compile_context>

<pallas_src>
import functools
import math
from typing import NamedTuple

import jax
import jax.numpy as jnp
from jax.experimental import pallas as pl
from jax.experimental.pallas import tpu as pltpu

_EPS = 1e-5


def _round_up(x, m):
    return ((x + m - 1) // m) * m


def _tpu_vmem_budget():
    """Return (vmem_limit_bytes, default_row_tile) for the current TPU gen."""
    try:
        vmem_bytes = int(pltpu.get_tpu_info().vmem_capacity_bytes)
    except Exception:
        vmem_bytes = 64 * 1024 * 1024  # conservative (v7x-sized) fallback
    if vmem_bytes >= 100 * 1024 * 1024:          # v5e / v6e: 128 MiB per core
        return 100 * 1024 * 1024, 512
    # v7x-class: 64 MiB per TensorCore -> leave headroom for Mosaic scratch.
    return min(vmem_bytes - 8 * 1024 * 1024, 56 * 1024 * 1024), 256


class PreparedParams(NamedTuple):
    w1_p: jax.Array     # [input_dim, h_p]
    gamma_p: jax.Array  # [1, h_p] f32
    beta_p: jax.Array   # [1, h_p] f32
    w2_p: jax.Array     # [h_p, d_out_p]
    b2_p: jax.Array     # [1, d_out_p] f32
    input_dim: int
    hidden_dim: int
    output_dim: int


def prepare_params(params):
    """Pad params once (lane-pad hidden/output dims only); reusable across calls."""
    w1, b1, gamma, beta, w2, b2 = params
    del b1  # cancels exactly under training-mode BatchNorm (batch-mean subtraction)
    input_dim, hidden_dim = w1.shape
    output_dim = w2.shape[1]
    h_p = _round_up(hidden_dim, 128)
    d_out_p = _round_up(output_dim, 128)
    f32 = jnp.float32

    def pad_cols(a, cols):
        if a.shape[1] == cols:
            return a
        return jnp.zeros((a.shape[0], cols), a.dtype).at[:, :a.shape[1]].set(a)

    w1_p = pad_cols(w1, h_p)
    gamma_p = pad_cols(gamma.reshape(1, -1).astype(f32), h_p)
    beta_p = pad_cols(beta.reshape(1, -1).astype(f32), h_p)
    if w2.shape == (h_p, d_out_p):
        w2_p = w2
    else:
        w2_p = jnp.zeros((h_p, d_out_p), w2.dtype).at[:hidden_dim, :output_dim].set(w2)
    b2_p = pad_cols(b2.reshape(1, -1).astype(f32), d_out_p)
    return PreparedParams(w1_p, gamma_p, beta_p, w2_p, b2_p,
                          input_dim, hidden_dim, output_dim)


# --------------------------------------------------------------------------
# Pass 1: per-column sum / sum-of-squares of h = x @ W1 (BN batch statistics),
# accumulated as (8, h_p) sublane-partial blocks (pure VPU adds per step).
# --------------------------------------------------------------------------
def _stats_kernel(x_ref, w1_ref, sum_ref, sq_ref):
    @pl.when(pl.program_id(1) == 0)
    def _init():
        sum_ref[...] = jnp.zeros_like(sum_ref)
        sq_ref[...] = jnp.zeros_like(sq_ref)

    h = jnp.dot(x_ref[...], w1_ref[...], preferred_element_type=jnp.float32)
    rows = h.shape[0]
    blk = h[0:8, :]
    hsum = blk
    hsq = blk * blk
    for g in range(1, rows // 8):  # static unroll: sublane-aligned vreg adds
        blk = h[g * 8:(g + 1) * 8, :]
        hsum = hsum + blk
        hsq = hsq + blk * blk
    sum_ref[...] += hsum
    sq_ref[...] += hsq


# --------------------------------------------------------------------------
# Pass 2: fold BN stats into scale/shift in-kernel, recompute h, apply
# scale/shift + ReLU, second matmul, lane-dense padded output store.
# --------------------------------------------------------------------------
def _apply_kernel(x_ref, w1_ref, sum_ref, sq_ref, gamma_ref, beta_ref,
                  w2_ref, b2_ref, o_ref, *, inv_n):
    s = jnp.sum(sum_ref[...], axis=0, keepdims=True)    # (1, h_p)
    sq = jnp.sum(sq_ref[...], axis=0, keepdims=True)
    mean = s * inv_n
    # TODO(synk): E[h^2]-mean^2 can cancel badly when |mean| >> std; switch to
    # a shifted-sum / Welford accumulation if activations are far from zero-mean.
    var = jnp.maximum(sq * inv_n - mean * mean, 0.0)
    scale = jax.lax.rsqrt(var + _EPS) * gamma_ref[...]   # 0 on padded hidden cols
    shift = beta_ref[...] - mean * scale

    h = jnp.dot(x_ref[...], w1_ref[...], preferred_element_type=jnp.float32)
    h = jnp.maximum(h * scale + shift, 0.0)
    out = jnp.dot(h.astype(w2_ref.dtype), w2_ref[...],
                  preferred_element_type=jnp.float32) + b2_ref[...]
    o_ref[...] = out.astype(o_ref.dtype)


def projector_forward(x, params, *, row_tile=None):
    """x: [..., input_dim] -> [prod(leading), output_dim] (matches PyTorch)."""
    prepared = params if isinstance(params, PreparedParams) else prepare_params(params)
    input_dim = prepared.input_dim
    output_dim = prepared.output_dim
    h_p = prepared.w1_p.shape[1]
    d_out_p = prepared.w2_p.shape[1]
    assert x.shape[-1] == input_dim

    f32 = jnp.float32
    x2d = x.reshape(-1, input_dim)
    n = x2d.shape[0]
    sub = 16 if x2d.dtype == jnp.bfloat16 else 8  # sublane packing granularity

    vmem_limit, default_tile = _tpu_vmem_budget()
    if row_tile is None:
        row_tile = default_tile
    tn = _round_up(min(row_tile, _round_up(n, sub)), sub)

    # Shrink the row tile if double-buffered x/out tiles + resident weights
    # would blow the per-generation VMEM budget.
    itemsize = x2d.dtype.itemsize
    weights_bytes = 2 * (prepared.w1_p.size * prepared.w1_p.dtype.itemsize +
                         prepared.w2_p.size * prepared.w2_p.dtype.itemsize)
    per_row = 2 * itemsize * input_dim + 2 * itemsize * d_out_p
    while tn > sub and weights_bytes + tn * per_row > int(0.85 * vmem_limit):
        tn = max(sub, _round_up(tn // 2, sub))

    n_p = _round_up(n, tn)
    num_tiles = n_p // tn
    # Only row-pad x (and only when needed); the K (input_dim) axis is NOT padded.
    x_p = x2d if n_p == n else jnp.zeros((n_p, input_dim), x2d.dtype).at[:n].set(x2d)

    # ---- pass 1: batch statistics of h = x @ W1 --------------------------
    split = 2 if (num_tiles % 2 == 0 and num_tiles >= 2) else 1  # megacore on v7x
    inner = num_tiles // split

    sum_h, sq_h = pl.pallas_call(
        _stats_kernel,
        out_shape=(jax.ShapeDtypeStruct((split * 8, h_p), f32),
                   jax.ShapeDtypeStruct((split * 8, h_p), f32)),
        grid=(split, inner),
        in_specs=[pl.BlockSpec((tn, input_dim), lambda c, i: (c * inner + i, 0)),
                  pl.BlockSpec((input_dim, h_p), lambda c, i: (0, 0))],
        out_specs=(pl.BlockSpec((8, h_p), lambda c, i: (c, 0)),
                   pl.BlockSpec((8, h_p), lambda c, i: (c, 0))),
        compiler_params=pltpu.CompilerParams(
            dimension_semantics=("parallel", "arbitrary"),
            vmem_limit_bytes=vmem_limit),
    )(x_p, prepared.w1_p)

    # ---- pass 2: fused BN fold + normalize + ReLU + second matmul ---------
    kernel2 = functools.partial(_apply_kernel, inv_n=1.0 / float(n))
    out_p = pl.pallas_call(
        kernel2,
        out_shape=jax.ShapeDtypeStruct((n_p, d_out_p), x2d.dtype),
        grid=(num_tiles,),
        in_specs=[pl.BlockSpec((tn, input_dim), lambda i: (i, 0)),
                  pl.BlockSpec((input_dim, h_p), lambda i: (0, 0)),
                  pl.BlockSpec((split * 8, h_p), lambda i: (0, 0)),
                  pl.BlockSpec((split * 8, h_p), lambda i: (0, 0)),
                  pl.BlockSpec((1, h_p), lambda i: (0, 0)),
                  pl.BlockSpec((1, h_p), lambda i: (0, 0)),
                  pl.BlockSpec((h_p, d_out_p), lambda i: (0, 0)),
                  pl.BlockSpec((1, d_out_p), lambda i: (0, 0))],
        out_specs=pl.BlockSpec((tn, d_out_p), lambda i: (i, 0)),
        compiler_params=pltpu.CompilerParams(
            dimension_semantics=("parallel",),
            vmem_limit_bytes=vmem_limit),
    )(x_p, prepared.w1_p, sum_h, sq_h, prepared.gamma_p, prepared.beta_p,
      prepared.w2_p, prepared.b2_p)

    return out_p[:n, :output_dim]


def init_params(key, input_dim, hidden_dim, output_dim, dtype=jnp.float32):
    """PyTorch-default-style init (uniform +-1/sqrt(fan_in); BN gamma=1, beta=0).
    Weights stored as [in, out]."""
    k1, k2, k3, k4 = jax.random.split(key, 4)
    bound1 = 1.0 / math.sqrt(input_dim)
    bound2 = 1.0 / math.sqrt(hidden_dim)
    w1 = jax.random.uniform(k1, (input_dim, hidden_dim), dtype, -bound1, bound1)
    b1 = jax.random.uniform(k2, (1, hidden_dim), dtype, -bound1, bound1)
    gamma = jnp.ones((1, hidden_dim), dtype)
    beta = jnp.zeros((1, hidden_dim), dtype)
    w2 = jax.random.uniform(k3, (hidden_dim, output_dim), dtype, -bound2, bound2)
    b2 = jax.random.uniform(k4, (1, output_dim), dtype, -bound2, bound2)
    return (w1, b1, gamma, beta, w2, b2)


def reference_forward(x, params):
    """Pure-JAX f32 reference (keeps b1; BN's mean subtraction cancels it)."""
    w1, b1, gamma, beta, w2, b2 = params
    x2d = x.reshape(-1, w1.shape[0]).astype(jnp.float32)
    h = x2d @ w1.astype(jnp.float32) + b1.astype(jnp.float32)
    mean = h.mean(axis=0, keepdims=True)
    var = ((h - mean) ** 2).mean(axis=0, keepdims=True)
    h = (h - mean) * jax.lax.rsqrt(var + _EPS) * gamma + beta
    h = jnp.maximum(h, 0.0)
    return h @ w2.astype(jnp.float32) + b2.astype(jnp.float32)


if __name__ == "__main__":
    input_dim, hidden_dim, output_dim = 32, 64, 16
    batch, seq = 2, 8

    key = jax.random.PRNGKey(0)
    kx, kp = jax.random.split(key)
    x = jax.random.normal(kx, (batch, seq, input_dim), jnp.float32)
    params = init_params(kp, input_dim, hidden_dim, output_dim)

    prepared = prepare_params(params)  # hoisted padding, reusable across calls

    # row_tile=8 -> 2 row tiles, exercising the megacore split and the
    # gridded stats accumulation.
    out = projector_forward(x, prepared, row_tile=8)
    out = jax.block_until_ready(out)

    ref = reference_forward(x, params)
    assert out.shape == (batch * seq, output_dim), out.shape
    assert jnp.allclose(out, ref, atol=1e-4, rtol=1e-4), (
        float(jnp.max(jnp.abs(out - ref))))

    print("KERNEL_OK")
</pallas_src>

<mosaic_0001>
module attributes {stable_mosaic.version = 11 : i64} {
  func.func @_stats_kernel(%arg0: i32, %arg1: i32, %arg2: memref<8x32xf32, #tpu.memory_space<vmem>>, %arg3: memref<32x128xf32, #tpu.memory_space<vmem>>, %arg4: memref<8x128xf32, #tpu.memory_space<vmem>>, %arg5: memref<8x128xf32, #tpu.memory_space<vmem>>) attributes {dimension_semantics = [#tpu.dimension_semantics<parallel>, #tpu.dimension_semantics<arbitrary>], iteration_bounds = array<i64: 2, 1>, scalar_prefetch = 0 : i64, scratch_operands = 0 : i64, tpu.core_type = #tpu.core_type<tc>, window_params = [{transform_indices = @transform_0, window_bounds = array<i64: 8, 32>}, {pipeline_mode = #tpu.pipeline_mode<synchronous>, transform_indices = @transform_1, window_bounds = array<i64: 32, 128>}, {transform_indices = @transform_2, window_bounds = array<i64: 8, 128>}, {transform_indices = @transform_3, window_bounds = array<i64: 8, 128>}]} {
    %c0_i32 = arith.constant 0 : i32
    %0 = arith.cmpi eq, %arg1, %c0_i32 : i32
    %1 = arith.extui %0 : i1 to i32
    %c0_i32_0 = arith.constant 0 : i32
    %2 = arith.cmpi ne, %1, %c0_i32_0 : i32
    scf.if %2 {
      %cst_12 = arith.constant 0.000000e+00 : f32
      %13 = vector.broadcast %cst_12 : f32 to vector<8x128xf32>
      %c0_13 = arith.constant 0 : index
      %c0_14 = arith.constant 0 : index
      %14 = vector.load %arg4[%c0_13, %c0_14] : memref<8x128xf32, #tpu.memory_space<vmem>>, vector<8x128xf32>
      tpu.vector_store %arg4[%c0_13, %c0_14], %13 {strides = array<i32>} : memref<8x128xf32, #tpu.memory_space<vmem>>, vector<8x128xf32>,
      %cst_15 = arith.constant 0.000000e+00 : f32
      %15 = vector.broadcast %cst_15 : f32 to vector<8x128xf32>
      %c0_16 = arith.constant 0 : index
      %c0_17 = arith.constant 0 : index
      %16 = vector.load %arg5[%c0_16, %c0_17] : memref<8x128xf32, #tpu.memory_space<vmem>>, vector<8x128xf32>
      tpu.vector_store %arg5[%c0_16, %c0_17], %15 {strides = array<i32>} : memref<8x128xf32, #tpu.memory_space<vmem>>, vector<8x128xf32>,
    } else {
    }
    %c0 = arith.constant 0 : index
    %c0_1 = arith.constant 0 : index
    %3 = vector.load %arg2[%c0, %c0_1] : memref<8x32xf32, #tpu.memory_space<vmem>>, vector<8x32xf32>
    %c0_2 = arith.constant 0 : index
    %c0_3 = arith.constant 0 : index
    %4 = vector.load %arg3[%c0_2, %c0_3] : memref<32x128xf32, #tpu.memory_space<vmem>>, vector<32x128xf32>
    %cst = arith.constant dense<0.000000e+00> : vector<8x128xf32>
    %5 = tpu.matmul %3, %4, %cst {dimension_numbers = #tpu.dot_dimension_numbers<[1], [0], [0], [1], [0, 0, 1, 1], [], []>} : vector<8x32xf32>, vector<32x128xf32>, vector<8x128xf32> -> vector<8x128xf32>
    %6 = arith.mulf %5, %5 : vector<8x128xf32>
    %c0_4 = arith.constant 0 : index
    %c0_5 = arith.constant 0 : index
    %7 = vector.load %arg4[%c0_4, %c0_5] : memref<8x128xf32, #tpu.memory_space<vmem>>, vector<8x128xf32>
    %8 = arith.addf %7, %5 : vector<8x128xf32>
    %c0_6 = arith.constant 0 : index
    %c0_7 = arith.constant 0 : index
    %9 = vector.load %arg4[%c0_6, %c0_7] : memref<8x128xf32, #tpu.memory_space<vmem>>, vector<8x128xf32>
    tpu.vector_store %arg4[%c0_6, %c0_7], %8 {strides = array<i32>} : memref<8x128xf32, #tpu.memory_space<vmem>>, vector<8x128xf32>,
    %c0_8 = arith.constant 0 : index
    %c0_9 = arith.constant 0 : index
    %10 = vector.load %arg5[%c0_8, %c0_9] : memref<8x128xf32, #tpu.memory_space<vmem>>, vector<8x128xf32>
    %11 = arith.addf %10, %6 : vector<8x128xf32>
    %c0_10 = arith.constant 0 : index
    %c0_11 = arith.constant 0 : index
    %12 = vector.load %arg5[%c0_10, %c0_11] : memref<8x128xf32, #tpu.memory_space<vmem>>, vector<8x128xf32>
    tpu.vector_store %arg5[%c0_10, %c0_11], %11 {strides = array<i32>} : memref<8x128xf32, #tpu.memory_space<vmem>>, vector<8x128xf32>,
    return
  }
  func.func @transform_0(%arg0: i32, %arg1: i32) -> (i32, i32) {
    %c1_i32 = arith.constant 1 : i32
    %0 = arith.muli %arg0, %c1_i32 : i32
    %1 = arith.addi %0, %arg1 : i32
    %c0_i32 = arith.constant 0 : i32
    %c0_i32_0 = arith.constant 0 : i32
    return %1, %c0_i32 : i32, i32
  }
  func.func @transform_1(%arg0: i32, %arg1: i32) -> (i32, i32) {
    %c0_i32 = arith.constant 0 : i32
    %c0_i32_0 = arith.constant 0 : i32
    %c0_i32_1 = arith.constant 0 : i32
    return %c0_i32, %c0_i32_0 : i32, i32
  }
  func.func @transform_2(%arg0: i32, %arg1: i32) -> (i32, i32) {
    %c0_i32 = arith.constant 0 : i32
    %c0_i32_0 = arith.constant 0 : i32
    return %arg0, %c0_i32 : i32, i32
  }
  func.func @transform_3(%arg0: i32, %arg1: i32) -> (i32, i32) {
    %c0_i32 = arith.constant 0 : i32
    %c0_i32_0 = arith.constant 0 : i32
    return %arg0, %c0_i32 : i32, i32
  }
}

</mosaic_0001>

<bundles_post_ra>
// kernel: tpu_custom_call.1
= control target key start
LH: loop header
LB: loop body
LE: loop exit
PB: predicated region body
PF: predicated region fallthrough
CT: control target
= control target key end

     0   :  { %9 = vsyncpa [#allocation3], 0  ;;  %s1056_s0 = inlined_call_operand.hbm [shape: f32[16,32], index: 0, kind: input, shape index: {}]   ;;  %s1057_s1 = inlined_call_operand.hbm [shape: f32[32,128], index: 1, kind: input, shape index: {}]   ;;  %s1058_s2 = inlined_call_operand.hbm [shape: f32[16,128], index: 2, kind: output, shape index: {0}]   ;;  %s1059_s3 = inlined_call_operand.hbm [shape: f32[16,128], index: 3, kind: output, shape index: {1}]  }
   0x1   :  { %11 = vsyncpa [#allocation3 + $0x1], 0 }
   0x2   :  { %12 = vsyncpa [#allocation6], 0 }
   0x3   :  { %13 = vsyncpa [#allocation4], 0 }
   0x4   :  { %15 = vsyncpa [#allocation4 + $0x1], 0 }
   0x5   :  { %16 = vsyncpa [#allocation9], 0 }
   0x6   :  { %18 = vsyncpa [#allocation9 + $0x1], 0  ;;  %s804_s12 = smov 0   ;;  %s806_s13 = smov 0  }
   0x7   :  { %s808_s14 = smov 0   ;;  %s810_s15 = smov 0  }
   0x8   :  { %s812_s16 = smov 0   ;;  %s814_s17 = smov 0  }
   0x9 LB: > { %s473_s18 = sadd.s32 4294967295, %s773_s17   ;;  %s474_s19 = sadd.s32 4294967294, %s773_s17   ;;  %s773_s17 = sphi %s814_s17, %s24_s17   ;;  %s769_s16 = sphi %s812_s16, %s1083_s16   ;;  %s765_s15 = sphi %s810_s15, %s1082_s15   ;;  %s761_s14 = sphi %s808_s14, %s1081_s14   ;;  %s757_s13 = sphi %s806_s13, %s1080_s13   ;;  %s753_s12 = sphi %s804_s12, %s1079_s12  }
   0xa   : > { %p58_p0 = scmp.ne.s32.totalorder %s757_s13, %s753_s12  ;;  %p838_p1 = scmp.eq.s32.totalorder %s473_s18, 0 }
   0xb   : > { %p842_p2 = scmp.eq.s32.totalorder %s473_s18, 1  ;;  %p109_p3 = scmp.eq.s32.totalorder %s474_s19, 1 }
   0xc   : > { %s1064_s20 = scalar_select %p838_p1, 1, 0 }
   0xd   : > { %s1065_s21 = scalar_select %p842_p2, 1, 0 }
   0xe   : > { %p848_p4 = por %p838_p1, %p58_p0  ;;  %p475_p5 = scmp.ge.s32.totalorder %s773_s17, 1 }
   0xf   : > { %p853_p6 = por %p109_p3, %p58_p0  ;;  %p142_p7 = scmp.lt.s32.totalorder %s773_s17, 3 }
  0x10   : > { %s1066_s22 = scalar_select %p848_p4, 1, 0 }
  0x11   : > { %s1067_s23 = scalar_select %p853_p6, 1, 0 }
  0x12   : > { %p858_p8 = pnand %p475_p5, %p142_p7  ;;  %s775_s25 = smov [#allocation5]  }
  0x13   : > { %s154_s26 = sshll.u32 %s775_s25, 4  ;;  %s36_s28 = sadd.s32 1, %s769_s16  ;;  %s155_s26 = int_to_ptr.vmem [resolvable:$true] %s154_s26 }
  0x14   : > { %s1068_s24 = scalar_select %p858_p8, 1, 0 }
  0x15   : > { %p524_p9 = pneg %p858_p8  ;;  %s597_s4 = scalar_lea.hbm %s1057_s1, 512 }
  0x16   : > { %p598_p12 = scmp.ne.s32.totalorder %s1057_s1, %s597_s4  ;;  %p604_p5 = scmp.lt.u32.totalorder %s597_s4, %s1057_s1 }
  0x17   : > { %p867_p11 = pnand %p524_p9, %p838_p1 }
  0x19   : > { %p599_p13 = pneg %p867_p11 }
  0x1b   : > { %p600_p0 = pnand %p599_p13, %p598_p12 }
  0x1d   : > { %p601_p3 = pneg %p600_p0 }
  0x1f   : > { %p606_p7 = pnand %p604_p5, %p601_p3 }
  0x21   : > { %609 = shalt.err (!%p606_p7)
}
  0x22   : > { %s610_s9 = scalar_lea.vmem %s155_s26, 512  ;;  %p618_p1 = scmp.lt.s32.totalorder %s155_s26, %s155_s26 }
  0x23   : > { %p611_p9 = scmp.ne.s32.totalorder %s155_s26, %s610_s9  ;;  %p619_p4 = scmp.lt.s32.totalorder %s610_s9, %s610_s9 }
  0x25   : > { %p613_p10 = pnand %p611_p9, %p599_p13  ;;  %p620_p8 = por %p619_p4, %p618_p1 }
  0x27   : > { %p614_p6 = pneg %p613_p10 }
  0x29   : > { %p621_p2 = pnand %p620_p8, %p614_p6 }
  0x2b   : > { %624 = shalt.err (!%p621_p2)
}
  0x2c   : > { %s776_s10 = smov 128   ;;  %s777_s11 = smov 8  }
  0x2d   : > { %527 = dma.hbm_to_vmem [thread:$0]  (!%p867_p11), %s1057_s1, 512, %s155_s26, [#allocation6], %s776_s10, %s776_s10, %s777_s11  }
  0x2e   : > { %p38_p1 = scmp.ge.s32.totalorder %s36_s28, 2  ;;  %s45_s25 = sadd.s32 1, %s761_s14 }
  0x2f   : > { %p52_p2 = scmp.ne.s32.totalorder %s761_s14, %s757_s13  ;;  %p53_p4 = scmp.eq.s32.totalorder %s773_s17, 0 }
  0x30   : > { %s1085_s28 = smov (%p38_p1, %s36_s28), 0  ;;  %p1071_p8 = scmp.ne.s32.totalorder %s1065_s21, 0 }
  0x31   : > { %p894_p6 = por %p53_p4, %p52_p2  ;;  %s42_s27 = ssub.s32 %s769_s16, %s1085_s28 }
  0x32   : > { %p900_p10 = por %p1071_p8, %p52_p2  ;;  %p540_p12 = scmp.lt.s32.totalorder %s773_s17, 2 }
  0x33   : > { %p43_p11 = scmp.eq.s32.totalorder %s42_s27, 0  ;;  %s168_s26 = sand.u32 1, %s761_s14  }
  0x34   : > { %s478_s4 = sshll.u32 %s168_s26, 3  ;;  %s479_s6 = sshll.u32 %s769_s16, 7 }
  0x35   : > { %s909_s5 = scalar_select %p43_p11, %s761_s14, %s45_s25  }
  0x36   : > { %s915_s9 = scalar_lea.hbm %s1056_s0, %s479_s6  ;;  %s172_s21 = scalar_lea.vmem [#allocation2], %s478_s4 }
  0x37   : > { %s180_s10 = sshll.u32 %s172_s21, 4  ;;  %p921_p13 = pnand %p540_p12, %p894_p6  ;;  %s917_s10 = int_to_ptr.vmem [resolvable:$true] %s180_s10 }
  0x38   : > { %s169_s18 = scalar_lea.sflag [#allocation3], %s168_s26  ;;  %s625_s19 = scalar_lea.hbm %s915_s9, 128 }
  0x39   : > { %p626_p0 = scmp.ne.s32.totalorder %s915_s9, %s625_s19  ;;  %p627_p3 = pneg %p921_p13 }
  0x3a   : > { %s630_s4 = scalar_lea.hbm %s1056_s0, 256  ;;  %p631_p9 = scmp.lt.u32.totalorder %s915_s9, %s1056_s0 }
  0x3b   : > { %p628_p5 = pnand %p627_p3, %p626_p0  ;;  %p632_p1 = scmp.lt.u32.totalorder %s630_s4, %s625_s19 }
  0x3c   : > { %p634_p4 = scmp.lt.u32.totalorder %s625_s19, %s915_s9 }
  0x3d   : > { %p629_p7 = pneg %p628_p5  ;;  %p633_p2 = por %p632_p1, %p631_p9 }
  0x3f   : > { %p635_p6 = por %p634_p4, %p633_p2 }
  0x41   : > { %p636_p8 = pnand %p635_p6, %p629_p7 }
  0x43   : > { %639 = shalt.err (!%p636_p8)
}
  0x44   : > { %s640_s26 = scalar_lea.vmem %s917_s10, 128  ;;  %s778_s7 = smov [#allocation2]  }
  0x45   : > { %p641_p12 = scmp.ne.s32.totalorder %s917_s10, %s640_s26  ;;  %s645_s8 = sshll.u32 %s778_s7, 4  ;;  %s646_s8 = int_to_ptr.vmem [resolvable:$false] %s645_s8 }
  0x46   : > { %s647_s21 = scalar_lea.vmem %s646_s8, 256  ;;  %p648_p5 = scmp.lt.s32.totalorder %s917_s10, %s646_s8 }
  0x47   : > { %p643_p11 = pnand %p641_p12, %p627_p3  ;;  %p649_p9 = scmp.lt.s32.totalorder %s647_s21, %s640_s26 }
  0x49   : > { %p644_p0 = pneg %p643_p11  ;;  %p650_p1 = por %p649_p9, %p648_p5 }
  0x4b   : > { %p651_p2 = pnand %p650_p1, %p644_p0 }
  0x4d   : > { %654 = shalt.err (!%p651_p2)
}
  0x4e   : > { %531 = dma.hbm_to_vmem [thread:$0]  (!%p921_p13), %s915_s9, 128, %s917_s10, %s169_s18  }
  0x4f   : > { %p1074_p7 = scmp.ne.s32.totalorder %s1068_s24, 0 }
  0x50   : > { %s953_s19 = sand.u32 (!%p1074_p7), 1, %s757_s13   ;;  %p1075_p3 = scmp.ne.s32.totalorder (!%p1074_p7), %s1066_s22, 0 }
  0x51   : > { %189 = sbr.rel (%p1074_p7) target bundleno = 352 (0x160), region = 28  ;;  %s956_s25 = sshll.u32 (!%p1074_p7), %s953_s19, 3 }
  0x52   : > { %s192_s27 = scalar_lea.sflag (!%p1074_p7), [#allocation3], %s953_s19  ;;  %s195_s4 = scalar_lea.vmem (!%p1074_p7), [#allocation2], %s956_s25 }
  0x58   : > { %736 = dma.done.wait (%p1075_p3), %s192_s27, 128  }
  0x59   : > { %738 = vsyncadd (%p1075_p3), %s192_s27, 4294967168  ;;  %p1076_p13 = scmp.ne.s32.totalorder %s1064_s20, 0 }
  0x5b   : > { %740 = dma.done.wait (%p1076_p13), [#allocation6], 512  }
  0x5c   : > { %742 = vsyncadd (%p1076_p13), [#allocation6], 4294966784  ;;  %v779_v0 = vmov 0.0|0.0   ;;  %vm780_vm0 = vmmov 0   ;;  %v781_v1 = vmov 0.0   ;;  %v235_v2 = vld [vmem:[#allocation5] sm:$0xff] }
  0x5d   : > { %508 = vmatprep.subr.bf16.mxu0 %v779_v0  ;;  %505 = vmatprep.mubr.msk.f32.mxu0 %vm780_vm0, %v781_v1  ;;  %v236_v3 = vld [vmem:[#allocation5 + $0x8] sm:$0xff]  ;;  %v237_v4 = vld [vmem:[#allocation5 + $0x10] sm:$0xff]  ;;  %v238_v6 = vld [vmem:[#allocation5 + $0x18] sm:$0xff]  ;;  %vm239_vm1 = vcmask 261120   ;;  %s488_s20 = sshll.u32 %s765_s15, 7  ;;  %s219_s22 = scalar_lea.vmem [#allocation7], %s956_s25 }
  0x5e   : > { %v509_v5 = vpack.c.bf16 %v236_v3, %v235_v2  ;;  %v512_v7 = vpack.c.bf16 %v238_v6, %v237_v4  ;;  %v234_v8 = vld [vmem:[%s195_s4] sm:$0xff]  ;;  %s339_s24 = sshll.u32 %s219_s22, 4  ;;  %s226_s9 = scalar_lea.vmem [#allocation8], %s956_s25  ;;  %s978_s24 = int_to_ptr.vmem [resolvable:$true] %s339_s24 }
  0x5f   : > { %s352_s10 = sshll.u32 %s226_s9, 4  ;;  %s976_s29 = scalar_lea.hbm %s1058_s2, %s488_s20  ;;  %s985_s10 = int_to_ptr.vmem [resolvable:$true] %s352_s10 }
  0x60   : > { %510 = vmatpush3.bf16.msra.mxu0 %v509_v5  ;;  %s983_s26 = scalar_lea.hbm %s1059_s3, %s488_s20  ;;  %s321_s7 = scalar_lea.sflag [#allocation4], %s953_s19 }
  0x61   : > { %511 = vmatprep.subr.bf16.mxu0 %v779_v0  ;;  %s655_s8 = scalar_lea.vmem %s978_s24, 128  ;;  %s782_s21 = smov [#allocation7]  }
  0x62   : > { %p656_p4 = scmp.ne.s32.totalorder %s978_s24, %s655_s8  ;;  %s659_s27 = sshll.u32 %s782_s21, 4  ;;  %s660_s27 = int_to_ptr.vmem [resolvable:$false] %s659_s27 }
  0x63   : > { %s661_s4 = scalar_lea.vmem %s660_s27, 256  ;;  %p662_p12 = scmp.lt.s32.totalorder %s978_s24, %s660_s27 }
  0x64   : > { %513 = vmatpush3.bf16.msra.mxu0 %v512_v7  ;;  %p657_p6 = pnand %p656_p4, %p900_p10  ;;  %p663_p11 = scmp.lt.s32.totalorder %s661_s4, %s655_s8 }
  0x66   : > { %p658_p8 = pneg %p657_p6  ;;  %p664_p0 = por %p663_p11, %p662_p12 }
  0x67   : > { %506 = vmatmul.mubr.msk.f32.vlgmr.msra.gmra.mrb[0].mxu0 %vm239_vm1, %v234_v8 }
  0x68   : > { %p665_p5 = pnand %p664_p0, %p658_p8 }
 0x13a   : > { %v309_v9 = vpop.f32.mrb[0].mxu0 }
 0x13b   : > { %v313_v10 = vmul.f32 %v309_v9, %v309_v9  ;;  %v507_v11 = vpop.f32.mrb[1].mxu0  ;;  %316 = vst [vmem:[%s219_s22] sm:$0xff] %v309_v9 }
 0x13c   : > { %668 = shalt.err (!%p665_p5)
}
 0x13d   : > { %s669_s20 = scalar_lea.hbm %s976_s29, 128  ;;  %s673_s18 = scalar_lea.hbm %s1058_s2, 256 }
 0x13e   : > { %p670_p9 = scmp.ne.s32.totalorder %s976_s29, %s669_s20  ;;  %p674_p7 = scmp.lt.u32.totalorder %s976_s29, %s1058_s2 }
 0x13f   : > { %p675_p3 = scmp.lt.u32.totalorder %s673_s18, %s669_s20  ;;  %p677_p4 = scmp.lt.u32.totalorder %s669_s20, %s976_s29 }
 0x140   : > { %p671_p1 = pnand %p670_p9, %p900_p10 }
 0x141   : > { %p676_p13 = por %p675_p3, %p674_p7 }
 0x142   : > { %p672_p2 = pneg %p671_p1 }
 0x143   : > { %p678_p6 = por %p677_p4, %p676_p13 }
 0x145   : > { %p679_p8 = pnand %p678_p6, %p672_p2 }
 0x147   : > { %682 = shalt.err (!%p679_p8)
}
 0x148   : > { %520 = dma.vmem_to_hbm [thread:$0]  (%p900_p10), %s978_s24, 128, %s976_s29, %s321_s7   ;;  %319 = vst [vmem:[%s226_s9] sm:$0xff] %v313_v10 }
 0x149   : > { %s326_s8 = scalar_lea.sflag [#allocation9], %s953_s19  ;;  %s683_s21 = scalar_lea.vmem %s985_s10, 128 }
 0x14a   : > { %p684_p12 = scmp.ne.s32.totalorder %s985_s10, %s683_s21  ;;  %s783_s27 = smov [#allocation8]  }
 0x14b   : > { %s687_s4 = sshll.u32 %s783_s27, 4  ;;  %s688_s4 = int_to_ptr.vmem [resolvable:$false] %s687_s4 }
 0x14c   : > { %p685_p11 = pnand %p684_p12, %p900_p10  ;;  %s689_s20 = scalar_lea.vmem %s688_s4, 256 }
 0x14d   : > { %p690_p5 = scmp.lt.s32.totalorder %s985_s10, %s688_s4  ;;  %p691_p9 = scmp.lt.s32.totalorder %s689_s20, %s683_s21 }
 0x14e   : > { %p686_p0 = pneg %p685_p11 }
 0x14f   : > { %p692_p1 = por %p691_p9, %p690_p5 }
 0x151   : > { %p693_p2 = pnand %p692_p1, %p686_p0 }
 0x153   : > { %696 = shalt.err (!%p693_p2)
}
 0x154   : > { %s697_s19 = scalar_lea.hbm %s983_s26, 128  ;;  %s701_s9 = scalar_lea.hbm %s1059_s3, 256 }
 0x155   : > { %p698_p7 = scmp.ne.s32.totalorder %s983_s26, %s697_s19  ;;  %p702_p4 = scmp.lt.u32.totalorder %s983_s26, %s1059_s3 }
 0x156   : > { %p703_p6 = scmp.lt.u32.totalorder %s701_s9, %s697_s19  ;;  %p705_p12 = scmp.lt.u32.totalorder %s697_s19, %s983_s26 }
 0x157   : > { %p699_p3 = pnand %p698_p7, %p900_p10 }
 0x158   : > { %p704_p8 = por %p703_p6, %p702_p4 }
 0x159   : > { %p700_p13 = pneg %p699_p3 }
 0x15a   : > { %p706_p11 = por %p705_p12, %p704_p8 }
 0x15c   : > { %p707_p0 = pnand %p706_p11, %p700_p13 }
 0x15e   : > { %710 = shalt.err (!%p707_p0)
}
 0x15f   : > { %521 = dma.vmem_to_hbm [thread:$0]  (%p900_p10), %s985_s10, 128, %s983_s26, %s326_s8  }
 0x160 PF: > { %s364_s22 = sand.u32 1, %s753_s12   ;;  %p1077_p5 = scmp.ne.s32.totalorder %s1067_s23, 0 }
 0x161   : > { %p1078_p9 = scmp.ge.s32.totalorder %s773_s17, 2  ;;  %s365_s11 = scalar_lea.sflag [#allocation4], %s364_s22 }
 0x163   : > { %p533_p1 = pnand %p1078_p9, %p1077_p5 }
 0x165   : > { %744 = dma.done.wait (!%p533_p1), %s365_s11, 128  }
 0x166   : > { %746 = vsyncadd (!%p533_p1), %s365_s11, 4294967168  ;;  %s374_s18 = scalar_lea.sflag [#allocation9], %s364_s22 }
 0x167   : > { %748 = dma.done.wait (!%p533_p1), %s374_s18, 128  }
 0x168   : > { %750 = vsyncadd (!%p533_p1), %s374_s18, 4294967168  ;;  %s24_s17 = sadd.s32 1, %s773_s17   ;;  %s1079_s12 = smov %s757_s13 }
 0x169   : > { %p21_p2 = scmp.ge.s32.totalorder %s24_s17, 4   ;;  %s1080_s13 = smov %s761_s14 }
 0x16a   : > { %s1081_s14 = smov %s909_s5  ;;  %s1082_s15 = smov %s769_s16 }
 0x16b   : > { %s1083_s16 = smov %s1085_s28  ;;  %23 = sbr.rel (!%p21_p2) target bundleno = 9 (0x9), region = 98 }
 0x172   :  { %379 = vsyncpa [#allocation3], 1 }
 0x173   :  { %381 = vsyncpa [#allocation3 + $0x1], 1 }
 0x174   :  { %382 = vsyncpa [#allocation6], 1 }
 0x175   :  { %383 = vsyncpa [#allocation4], 1 }
 0x176   :  { %385 = vsyncpa [#allocation4 + $0x1], 1 }
 0x177   :  { %386 = vsyncpa [#allocation9], 1 }
 0x178   :  { %388 = vsyncpa [#allocation9 + $0x1], 1 }

</bundles_post_ra>
